<compile_context>
chip_gen: v6e
topology: v6e:2x2x1
jax: 0.10.0
libtpu: 0.0.40
codegen_flags: <defaults>
</compile_context>

<pallas_src>
import functools

import numpy as np
import jax
import jax.numpy as jnp
from jax import lax
from jax.experimental import pallas as pl
from jax.experimental.pallas import tpu as pltpu

_PI = float(np.pi)
_TWO_PI = float(2.0 * np.pi)
_INV_TWO_PI = float(1.0 / (2.0 * np.pi))
_PIO2 = float(np.pi / 2.0)
_PIO4 = float(np.pi / 4.0)
_TAN3PIO8 = 2.414213562373095   # tan(3*pi/8)
_TANPIO8 = 0.4142135623730951   # tan(pi/8)


def _atan2(y, x):
    """Polynomial atan2 (Cephes atanf range reduction) with one approx reciprocal.

    TODO(synk): native Mosaic lowering of lax.atan2 is not guaranteed; this uses
    only mul/add/recip/select and is accurate to ~1e-4 rad worst case (approx
    reciprocal), far inside the tolerance after the 1/N IFFT attenuation.
    """
    ay = jnp.abs(y)
    ax = jnp.abs(x)
    big = ay > _TAN3PIO8 * ax
    mid = ay > _TANPIO8 * ax
    num = jnp.where(big, -ax, jnp.where(mid, ay - ax, ay))
    den = jnp.where(big, ay, jnp.where(mid, ay + ax, ax))
    xr = num * pl.reciprocal(jnp.maximum(den, 1e-30), approx=True)  # EUP, off VPU path
    y0 = jnp.where(big, _PIO2, jnp.where(mid, _PIO4, 0.0))
    z = xr * xr
    p = ((((8.05374449538e-2 * z - 1.38776856032e-1) * z
           + 1.99777106478e-1) * z - 3.33329491539e-1) * z) * xr + xr
    a = y0 + p
    ang = jnp.where(x >= 0.0, a, _PI - a)
    return jnp.where(y >= 0.0, ang, -ang)


def _wrap_pi(t):
    """Wrap phase to [-pi, pi). NOTE: maps +pi -> -pi (torch.angle returns +pi);
    measure-zero boundary, sign-irrelevant in the cos-based out_gamma!=0 path."""
    return t - _TWO_PI * jnp.floor(t * _INV_TWO_PI + 0.5)


def _gc2gc_kernel(c_ref, wf_ref, wic_ref, *rest, in_gamma, out_gamma, nbm):
    # rest = (wis_ref, wnyq_ref, o_ref) when out_gamma == 0 else (wnyq_ref, o_ref)
    if out_gamma == 0.0:
        wis_ref, wnyq_ref, o_ref = rest
    else:
        wnyq_ref, o_ref = rest

    x = c_ref[...].astype(jnp.float32)                              # (TB, M1)

    # Forward real-input DFT over bins 0..n_fft/2-1 as ONE bf16 matmul producing
    # both planes: wf = [cos | -sin], row 0 zeroed (folds the reference's
    # c01 = pad(c1[...,1:],(1,0)) masking).  The Nyquist bin is purely real and
    # its cos column is packed into the otherwise-zero imag lane 0.
    crci = jnp.dot(x.astype(jnp.bfloat16), wf_ref[...],
                   preferred_element_type=jnp.float32)              # (TB, 2*nbm)
    cr = crci[:, :nbm]
    ci_raw = crci[:, nbm:]
    crN = ci_raw[:, 0:1]                                            # Nyquist real part
    col = lax.broadcasted_iota(jnp.int32, ci_raw.shape, 1)
    ci = jnp.where(col == 0, 0.0, ci_raw)                           # true DC imag is 0

    # log-magnitude / phase of sC1 (gamma-warped spectrum); gamma==0 branches are
    # compile-time specialized.  Nyquist column has exactly zero imag part, so its
    # nonlinearity needs no atan2/cos (just log/exp + a sign select).
    if in_gamma == 0.0:
        lg, ang = cr, ci
        lgN = crN
        nyq_neg = None
    else:
        ig = 1.0 / in_gamma
        ar = in_gamma * cr + 1.0
        ai = in_gamma * ci
        lg = (0.5 * ig) * jnp.log(jnp.maximum(ar * ar + ai * ai, 1e-30))
        ang = _atan2(ai, ar) * ig
        arN = in_gamma * crN + 1.0
        lgN = ig * jnp.log(jnp.maximum(jnp.abs(arN), 1e-30))
        nyq_neg = arN < 0.0
    ang = _wrap_pi(ang)   # principal value, like torch.angle(); cheap floor/fma

    if out_gamma == 0.0:
        # C2 = clog(sC1); IFFT = two accumulating bf16 dots (no concat copy).
        c02 = (jnp.dot(lg.astype(jnp.bfloat16), wic_ref[...],
                       preferred_element_type=jnp.float32)
               + jnp.dot(ang.astype(jnp.bfloat16), wis_ref[...],
                         preferred_element_type=jnp.float32))
        # Nyquist: sin(pi*m)=0, so only Re(C2_Nyq) = lgN contributes (rank-1 FMA).
        c02 = c02 + lgN * wnyq_ref[...]
    else:
        og = out_gamma
        c2 = (jnp.exp(og * lg) * jnp.cos(og * ang) - 1.0) * (1.0 / og)
        if in_gamma == 0.0:
            c2N = (jnp.exp(og * lgN) - 1.0) * (1.0 / og)
        else:
            # angle(sC1_Nyq) is either 0 or wrap(pi/in_gamma) (compile-time const).
            thN = np.pi / in_gamma
            thN = thN - 2.0 * np.pi * np.floor(thN / (2.0 * np.pi) + 0.5)
            cneg = float(np.cos(og * thN))
            c2N = (jnp.exp(og * lgN) * jnp.where(nyq_neg, cneg, 1.0) - 1.0) * (1.0 / og)
        c02 = jnp.dot(c2.astype(jnp.bfloat16), wic_ref[...],
                      preferred_element_type=jnp.float32)
        c02 = c02 + c2N * wnyq_ref[...]

    colo = lax.broadcasted_iota(jnp.int32, c02.shape, 1)
    out = jnp.where(colo == 0, x[:, 0:1], c02)                      # c2[...,0] = c1[...,0]
    o_ref[...] = out.astype(o_ref.dtype)


def _round_up(x, m):
    return ((x + m - 1) // m) * m


def _build_weights(m1, m2, m2p, n_fft, nbm, out_gamma):
    """Host-side (numpy) DFT / folded-IDFT weights. All scaling folded in:
    Hermitian fold (DC x1, interior x2, Nyquist handled separately), 1/n_fft,
    the output factor 2, and the c01 row-0 mask."""
    nb = n_fft // 2 + 1
    n = np.arange(m1, dtype=np.float64)[:, None]
    k = np.arange(nbm, dtype=np.float64)[None, :]
    ang_f = 2.0 * np.pi * n * k / n_fft
    wfc = np.cos(ang_f)
    wfs = np.sin(ang_f)
    wfc[:, nb - 1:] = 0.0                   # zero padded bins (no-op when nbm == nb-1)
    wfs[:, nb - 1:] = 0.0
    wf = np.zeros((m1, 2 * nbm), np.float64)
    wf[:, :nbm] = wfc                       # Re C1
    wf[:, nbm:] = -wfs                      # Im C1
    wf[:, nbm] = np.cos(np.pi * n[:, 0])    # Nyquist cos column packed in free imag lane 0
    wf[0, :] = 0.0                          # fold c01 = pad(c1[...,1:], (1,0)) masking

    k2 = np.arange(nbm, dtype=np.float64)[:, None]
    mm = np.arange(m2, dtype=np.float64)[None, :]
    ang_i = 2.0 * np.pi * k2 * mm / n_fft
    sk = np.where(k2 == 0, 1.0, 2.0)        # Hermitian fold: DC x1, interior x2
    wic = np.zeros((nbm, m2p), np.float64)
    wic[:, :m2] = 2.0 * sk * np.cos(ang_i) / n_fft     # extra 2x: c2[...,1:] = 2*c02[...,1:]
    wic[nb - 1:, :] = 0.0
    wis = None
    if float(out_gamma) == 0.0:
        wis = np.zeros((nbm, m2p), np.float64)
        wis[:, :m2] = -2.0 * sk * np.sin(ang_i) / n_fft
        wis[nb - 1:, :] = 0.0
        wis = jnp.asarray(wis.astype(np.float32)).astype(jnp.bfloat16)
    wnyq = np.zeros((1, m2p), np.float32)
    wnyq[0, :m2] = 2.0 * np.cos(np.pi * np.arange(m2)) / n_fft      # Nyquist fold x1

    wf = jnp.asarray(wf.astype(np.float32)).astype(jnp.bfloat16)
    wic = jnp.asarray(wic.astype(np.float32)).astype(jnp.bfloat16)
    return wf, wic, wis, jnp.asarray(wnyq)


def mgc2mgc(c, *, in_order, out_order, in_gamma, out_gamma, n_fft=512, tb=256):
    assert c.shape[-1] == in_order + 1, "dimension of cepstrum mismatch"
    assert n_fft % 2 == 0, "n_fft must be even"
    in_gamma = float(in_gamma)
    out_gamma = float(out_gamma)
    m1 = in_order + 1
    m2 = out_order + 1
    nbm = _round_up(n_fft // 2, 128)     # lane-aligned bins 0..n_fft/2-1 (Nyquist separate)
    m2p = _round_up(m2, 128)             # lane-dense output width (sliced in wrapper)

    orig_shape = c.shape
    out_dtype = c.dtype                  # kernel writes input dtype (bf16 in -> bf16 out)
    c2d = c.reshape(-1, m1).astype(jnp.float32)
    b = c2d.shape[0]

    # Batch tile: large to amortize the ~0.35us per-step pipeline overhead and fill
    # the MXU.  No forced 2-way split (pure overhead on single-TC v5e/v6e); on v7x
    # megacore sharding kicks in naturally once B > tb.  Rows are padded only up to
    # the tile (no pad at all for small B that is already a multiple of 8).
    bp8 = _round_up(max(b, 1), 8)
    tb_eff = max(8, min(_round_up(int(tb), 8), bp8))
    bp = _round_up(b, tb_eff)
    if bp != b:
        c2d = jnp.pad(c2d, ((0, bp - b), (0, 0)))

    wf, wic, wis, wnyq = _build_weights(m1, m2, m2p, n_fft, nbm, out_gamma)

    kernel = functools.partial(_gc2gc_kernel,
                               in_gamma=in_gamma, out_gamma=out_gamma, nbm=nbm)

    def _const_spec(shape):
        return pl.BlockSpec(shape, lambda i: (0, 0))

    in_specs = [pl.BlockSpec((tb_eff, m1), lambda i: (i, 0)),
                _const_spec(wf.shape), _const_spec(wic.shape)]
    operands = [c2d, wf, wic]
    if out_gamma == 0.0:
        in_specs.append(_const_spec(wis.shape))
        operands.append(wis)
    in_specs.append(_const_spec(wnyq.shape))
    operands.append(wnyq)

    cp_kwargs = dict(dimension_semantics=("parallel",))
    if tb_eff > 512:
        # Only needed when tb is pushed to >=1024 on v6e; default tile fits the
        # 32 MiB scoped limit on all generations (v7x has 64 MiB physical VMEM).
        cp_kwargs["vmem_limit_bytes"] = 64 * 1024 * 1024

    out = pl.pallas_call(
        kernel,
        out_shape=jax.ShapeDtypeStruct((bp, m2p), out_dtype),
        grid_spec=pltpu.PrefetchScalarGridSpec(
            num_scalar_prefetch=0,
            grid=(bp // tb_eff,),
            in_specs=in_specs,
            out_specs=pl.BlockSpec((tb_eff, m2p), lambda i: (i, 0)),
        ),
        compiler_params=pltpu.CompilerParams(**cp_kwargs),
    )(*operands)

    out = out[:b, :m2]
    return out.reshape(orig_shape[:-1] + (m2,)).astype(out_dtype)


def gc2gc_ref(c1, out_order, in_gamma, out_gamma, n_fft):
    """Pure-JAX mirror of the PyTorch _forward (uses jnp.fft), for verification."""
    c01 = jnp.concatenate([jnp.zeros_like(c1[..., :1]), c1[..., 1:]], axis=-1)
    C1 = jnp.fft.fft(c01, n=n_fft)
    if in_gamma == 0:
        sC1 = jnp.exp(C1)
    else:
        C1 = C1 * in_gamma + 1.0
        r = jnp.abs(C1) ** (1.0 / in_gamma)
        th = jnp.angle(C1) / in_gamma
        sC1 = r * jnp.exp(1j * th)
    if out_gamma == 0:
        C2 = jnp.log(sC1)
    else:
        r = jnp.abs(sC1) ** out_gamma
        th = jnp.angle(sC1) * out_gamma
        C2 = (r * jnp.cos(th) - 1.0) / out_gamma
    c02 = jnp.fft.ifft(C2).real[..., : out_order + 1]
    return jnp.concatenate([c1[..., :1], 2.0 * c02[..., 1:]], axis=-1)


if __name__ == "__main__":
    key = jax.random.PRNGKey(0)
    in_order, out_order, n_fft = 9, 12, 512
    B, T = 2, 4  # flattened batch = 8 rows
    c = 0.1 * jax.random.normal(key, (B, T, in_order + 1), dtype=jnp.float32)

    configs = [(0.0, 0.0), (0.0, -0.5), (-0.5, 0.0), (-0.5, -0.25)]
    for ig, og in configs:
        out = mgc2mgc(c, in_order=in_order, out_order=out_order,
                      in_gamma=ig, out_gamma=og, n_fft=n_fft)
        out = jax.block_until_ready(out)
        ref = gc2gc_ref(c, out_order, ig, og, n_fft)
        np.testing.assert_allclose(np.asarray(out), np.asarray(ref),
                                   rtol=1e-2, atol=1e-3)
    print("KERNEL_OK")
</pallas_src>

<mosaic_0001>
module attributes {stable_mosaic.version = 11 : i64} {
  func.func @_gc2gc_kernel(%arg0: i32, %arg1: memref<8x10xf32, #tpu.memory_space<vmem>>, %arg2: memref<10x512xbf16, #tpu.memory_space<vmem>>, %arg3: memref<256x128xbf16, #tpu.memory_space<vmem>>, %arg4: memref<256x128xbf16, #tpu.memory_space<vmem>>, %arg5: memref<1x128xf32, #tpu.memory_space<vmem>>, %arg6: memref<8x128xf32, #tpu.memory_space<vmem>>) attributes {dimension_semantics = [#tpu.dimension_semantics<parallel>], iteration_bounds = array<i64: 1>, scalar_prefetch = 0 : i64, scratch_operands = 0 : i64, tpu.core_type = #tpu.core_type<tc>, window_params = [{transform_indices = @transform_0, window_bounds = array<i64: 8, 10>}, {pipeline_mode = #tpu.pipeline_mode<synchronous>, transform_indices = @transform_1, window_bounds = array<i64: 10, 512>}, {pipeline_mode = #tpu.pipeline_mode<synchronous>, transform_indices = @transform_2, window_bounds = array<i64: 256, 128>}, {pipeline_mode = #tpu.pipeline_mode<synchronous>, transform_indices = @transform_3, window_bounds = array<i64: 256, 128>}, {pipeline_mode = #tpu.pipeline_mode<synchronous>, transform_indices = @transform_4, window_bounds = array<i64: 1, 128>}, {transform_indices = @transform_5, window_bounds = array<i64: 8, 128>}]} {
    %c0 = arith.constant 0 : index
    %c0_0 = arith.constant 0 : index
    %0 = vector.load %arg1[%c0, %c0_0] : memref<8x10xf32, #tpu.memory_space<vmem>>, vector<8x10xf32>
    %1 = arith.truncf %0 : vector<8x10xf32> to vector<8x10xbf16>
    %c0_1 = arith.constant 0 : index
    %c0_2 = arith.constant 0 : index
    %2 = vector.load %arg2[%c0_1, %c0_2] : memref<10x512xbf16, #tpu.memory_space<vmem>>, vector<10x512xbf16>
    %cst = arith.constant dense<0.000000e+00> : vector<8x512xf32>
    %3 = tpu.matmul %1, %2, %cst {dimension_numbers = #tpu.dot_dimension_numbers<[1], [0], [0], [1], [0, 0, 1, 1], [], []>} : vector<8x10xbf16>, vector<10x512xbf16>, vector<8x512xf32> -> vector<8x512xf32>
    %4 = vector.extract_strided_slice %3 {offsets = [0, 0], sizes = [8, 256], strides = [1, 1]} : vector<8x512xf32> to vector<8x256xf32>
    %5 = vector.extract_strided_slice %3 {offsets = [0, 256], sizes = [8, 256], strides = [1, 1]} : vector<8x512xf32> to vector<8x256xf32>
    %6 = vector.extract_strided_slice %5 {offsets = [0, 0], sizes = [8, 1], strides = [1, 1]} : vector<8x256xf32> to vector<8x1xf32>
    %7 = tpu.iota {dimensions = array<i32: 1>} : vector<8x256xi32>
    %c0_i32 = arith.constant 0 : i32
    %8 = vector.broadcast %c0_i32 : i32 to vector<8x256xi32>
    %9 = arith.cmpi eq, %7, %8 : vector<8x256xi32>
    %cst_3 = arith.constant 0.000000e+00 : f32
    %10 = vector.broadcast %cst_3 : f32 to vector<8x256xf32>
    %11 = arith.select %9, %10, %5 : vector<8x256xi1>, vector<8x256xf32>
    %cst_4 = arith.constant 0.159154937 : f32
    %12 = vector.broadcast %cst_4 : f32 to vector<8x256xf32>
    %13 = arith.mulf %11, %12 : vector<8x256xf32>
    %cst_5 = arith.constant 5.000000e-01 : f32
    %14 = vector.broadcast %cst_5 : f32 to vector<8x256xf32>
    %15 = arith.addf %13, %14 : vector<8x256xf32>
    %16 = math.floor %15 : vector<8x256xf32>
    %cst_6 = arith.constant 6.28318548 : f32
    %17 = vector.broadcast %cst_6 : f32 to vector<8x256xf32>
    %18 = arith.mulf %17, %16 : vector<8x256xf32>
    %19 = arith.subf %11, %18 : vector<8x256xf32>
    %20 = arith.truncf %4 : vector<8x256xf32> to vector<8x256xbf16>
    %c0_7 = arith.constant 0 : index
    %c0_8 = arith.constant 0 : index
    %21 = vector.load %arg3[%c0_7, %c0_8] : memref<256x128xbf16, #tpu.memory_space<vmem>>, vector<256x128xbf16>
    %cst_9 = arith.constant dense<0.000000e+00> : vector<8x128xf32>
    %22 = tpu.matmul %20, %21, %cst_9 {dimension_numbers = #tpu.dot_dimension_numbers<[1], [0], [0], [1], [0, 0, 1, 1], [], []>} : vector<8x256xbf16>, vector<256x128xbf16>, vector<8x128xf32> -> vector<8x128xf32>
    %23 = arith.truncf %19 : vector<8x256xf32> to vector<8x256xbf16>
    %c0_10 = arith.constant 0 : index
    %c0_11 = arith.constant 0 : index
    %24 = vector.load %arg4[%c0_10, %c0_11] : memref<256x128xbf16, #tpu.memory_space<vmem>>, vector<256x128xbf16>
    %cst_12 = arith.constant dense<0.000000e+00> : vector<8x128xf32>
    %25 = tpu.matmul %23, %24, %cst_12 {dimension_numbers = #tpu.dot_dimension_numbers<[1], [0], [0], [1], [0, 0, 1, 1], [], []>} : vector<8x256xbf16>, vector<256x128xbf16>, vector<8x128xf32> -> vector<8x128xf32>
    %26 = arith.addf %22, %25 : vector<8x128xf32>
    %c0_13 = arith.constant 0 : index
    %c0_14 = arith.constant 0 : index
    %27 = vector.load %arg5[%c0_13, %c0_14] : memref<1x128xf32, #tpu.memory_space<vmem>>, vector<1x128xf32>
    %28 = vector.broadcast %6 : vector<8x1xf32> to vector<8x128xf32>
    %29 = vector.broadcast %27 : vector<1x128xf32> to vector<8x128xf32>
    %30 = arith.mulf %28, %29 : vector<8x128xf32>
    %31 = arith.addf %26, %30 : vector<8x128xf32>
    %32 = tpu.iota {dimensions = array<i32: 1>} : vector<8x128xi32>
    %c0_i32_15 = arith.constant 0 : i32
    %33 = vector.broadcast %c0_i32_15 : i32 to vector<8x128xi32>
    %34 = arith.cmpi eq, %32, %33 : vector<8x128xi32>
    %35 = vector.extract_strided_slice %0 {offsets = [0, 0], sizes = [8, 1], strides = [1, 1]} : vector<8x10xf32> to vector<8x1xf32>
    %36 = vector.shape_cast %35 : vector<8x1xf32> to vector<8x1xf32>
    %37 = vector.broadcast %36 : vector<8x1xf32> to vector<8x128xf32>
    %38 = arith.select %34, %37, %31 : vector<8x128xi1>, vector<8x128xf32>
    %c0_16 = arith.constant 0 : index
    %c0_17 = arith.constant 0 : index
    %39 = vector.load %arg6[%c0_16, %c0_17] : memref<8x128xf32, #tpu.memory_space<vmem>>, vector<8x128xf32>
    tpu.vector_store %arg6[%c0_16, %c0_17], %38 {strides = array<i32>} : memref<8x128xf32, #tpu.memory_space<vmem>>, vector<8x128xf32>,
    return
  }
  func.func @transform_0(%arg0: i32) -> (i32, i32) {
    %c0_i32 = arith.constant 0 : i32
    %c0_i32_0 = arith.constant 0 : i32
    return %arg0, %c0_i32 : i32, i32
  }
  func.func @transform_1(%arg0: i32) -> (i32, i32) {
    %c0_i32 = arith.constant 0 : i32
    %c0_i32_0 = arith.constant 0 : i32
    %c0_i32_1 = arith.constant 0 : i32
    return %c0_i32, %c0_i32_0 : i32, i32
  }
  func.func @transform_2(%arg0: i32) -> (i32, i32) {
    %c0_i32 = arith.constant 0 : i32
    %c0_i32_0 = arith.constant 0 : i32
    %c0_i32_1 = arith.constant 0 : i32
    return %c0_i32, %c0_i32_0 : i32, i32
  }
  func.func @transform_3(%arg0: i32) -> (i32, i32) {
    %c0_i32 = arith.constant 0 : i32
    %c0_i32_0 = arith.constant 0 : i32
    %c0_i32_1 = arith.constant 0 : i32
    return %c0_i32, %c0_i32_0 : i32, i32
  }
  func.func @transform_4(%arg0: i32) -> (i32, i32) {
    %c0_i32 = arith.constant 0 : i32
    %c0_i32_0 = arith.constant 0 : i32
    %c0_i32_1 = arith.constant 0 : i32
    return %c0_i32, %c0_i32_0 : i32, i32
  }
  func.func @transform_5(%arg0: i32) -> (i32, i32) {
    %c0_i32 = arith.constant 0 : i32
    %c0_i32_0 = arith.constant 0 : i32
    return %arg0, %c0_i32 : i32, i32
  }
}

</mosaic_0001>

<bundles_post_ra>
// kernel: tpu_custom_call.1
= control target key start
LH: loop header
LB: loop body
LE: loop exit
PB: predicated region body
PF: predicated region fallthrough
CT: control target
= control target key end

     0   :  { %10 = vsyncpa [#allocation3], 0  ;;  %s898_s0 = inlined_call_operand.hbm [shape: f32[8,10], index: 0, kind: input, shape index: {}]   ;;  %s899_s1 = inlined_call_operand.hbm [shape: bf16[10,512], index: 1, kind: input, shape index: {}]   ;;  %s900_s2 = inlined_call_operand.hbm [shape: bf16[256,128], index: 2, kind: input, shape index: {}]   ;;  %s901_s3 = inlined_call_operand.hbm [shape: bf16[256,128], index: 3, kind: input, shape index: {}]   ;;  %s902_s4 = inlined_call_operand.vmem [shape: f32[1,128], index: 4, kind: input, shape index: {}]   ;;  %s903_s5 = inlined_call_operand.hbm [shape: f32[8,128], index: 5, kind: output, shape index: {}]  }
   0x1   :  { %11 = vsyncpa [#allocation6], 0 }
   0x2   :  { %12 = vsyncpa [#allocation9], 0 }
   0x3   :  { %13 = vsyncpa [#allocation4], 0  ;;  %s833_s18 = smov [#allocation5]  }
   0x4   :  { %s29_s19 = sshll.u32 %s833_s18, 4  ;;  %s30_s19 = int_to_ptr.vmem [resolvable:$true] %s29_s19 }
   0x5   :  { %s733_s20 = scalar_lea.vmem %s30_s19, 512  ;;  %p738_p1 = scmp.lt.s32.totalorder %s30_s19, %s30_s19 }
   0x6   :  { %p734_p0 = scmp.ne.s32.totalorder %s30_s19, %s733_s20  ;;  %p739_p2 = scmp.lt.s32.totalorder %s733_s20, %s733_s20 }
   0x8   :  { %p740_p3 = por %p739_p2, %p738_p1 }
   0xa   :  { %p741_p4 = pnand %p740_p3, %p734_p0 }
   0xc   :  { %744 = shalt.err (!%p741_p4)
}
   0xd   :  { %s834_s21 = smov 256   ;;  %s835_s22 = smov 16  }
   0xe   :  { %35 = dma.hbm_to_vmem [thread:$0]  %s899_s1, 512, %s30_s19, [#allocation6], %s834_s21, %s834_s21, %s835_s22  }
   0xf   :  { %s836_s25 = smov [#allocation2]   ;;  %s837_s27 = smov [#allocation7]  }
  0x10   :  { %s20_s26 = sshll.u32 %s836_s25, 4  ;;  %s41_s28 = sshll.u32 %s837_s27, 4  ;;  %s21_s26 = int_to_ptr.vmem [resolvable:$true] %s20_s26  ;;  %s42_s28 = int_to_ptr.vmem [resolvable:$true] %s41_s28 }
  0x11   :  { %s753_s29 = scalar_lea.vmem %s21_s26, 128  ;;  %p758_p6 = scmp.lt.s32.totalorder %s21_s26, %s21_s26 }
  0x12   :  { %p754_p5 = scmp.ne.s32.totalorder %s21_s26, %s753_s29  ;;  %p759_p7 = scmp.lt.s32.totalorder %s753_s29, %s753_s29 }
  0x14   :  { %p760_p8 = por %p759_p7, %p758_p6 }
  0x16   :  { %p761_p9 = pnand %p760_p8, %p754_p5 }
  0x18   :  { %764 = shalt.err (!%p761_p9)
}
  0x19   :  { %23 = dma.hbm_to_vmem [thread:$0]  %s898_s0, 128, %s21_s26, [#allocation3]  }
  0x1a   :  { %s773_s7 = scalar_lea.vmem %s42_s28, 2048  ;;  %p778_p11 = scmp.lt.s32.totalorder %s42_s28, %s42_s28 }
  0x1b   :  { %p774_p10 = scmp.ne.s32.totalorder %s42_s28, %s773_s7  ;;  %p779_p12 = scmp.lt.s32.totalorder %s773_s7, %s773_s7 }
  0x1d   :  { %p780_p13 = por %p779_p12, %p778_p11 }
  0x1f   :  { %p781_p0 = pnand %p780_p13, %p774_p10 }
  0x21   :  { %784 = shalt.err (!%p781_p0)
}
  0x22   :  { %s838_s1 = smov 64   ;;  %s839_s8 = smov 4  }
  0x23   :  { %47 = dma.hbm_to_vmem [thread:$0]  %s900_s2, 2048, %s42_s28, [#allocation6], %s838_s1, %s838_s1, %s839_s8  }
  0x24   :  { %s840_s11 = smov [#allocation8]  }
  0x25   :  { %s53_s12 = sshll.u32 %s840_s11, 4  ;;  %s54_s12 = int_to_ptr.vmem [resolvable:$true] %s53_s12 }
  0x26   :  { %s793_s13 = scalar_lea.vmem %s54_s12, 2048  ;;  %p798_p2 = scmp.lt.s32.totalorder %s54_s12, %s54_s12 }
  0x27   :  { %p794_p1 = scmp.ne.s32.totalorder %s54_s12, %s793_s13  ;;  %p799_p3 = scmp.lt.s32.totalorder %s793_s13, %s793_s13 }
  0x29   :  { %p800_p4 = por %p799_p3, %p798_p2 }
  0x2b   :  { %p801_p5 = pnand %p800_p4, %p794_p1 }
  0x2d   :  { %804 = shalt.err (!%p801_p5)
}
  0x2e   :  { %59 = dma.hbm_to_vmem [thread:$0]  %s901_s3, 2048, %s54_s12, [#allocation9], %s838_s1, %s838_s1, %s839_s8  }
  0x2f   :  { %825 = dma.done.wait [#allocation3], 128  }
  0x30   :  { %826 = vsyncadd [#allocation3], 4294967168 }
  0x31   :  { %827 = dma.done.wait [#allocation6], 2560  }
  0x32   :  { %828 = vsyncadd [#allocation6], 4294964736 }
  0x33   :  { %829 = dma.done.wait [#allocation9], 2048  }
  0x34   :  { %830 = vsyncadd [#allocation9], 4294965248  ;;  %v841_v0 = vmov 0   ;;  %vm101_vm0 = vcmask 1044480   ;;  %v885_v5 = vld [vmem:[#allocation2] sm:$0xff]  ;;  %vm97_vm1 = vcmask 80896   ;;  %v196_v41 = vlaneseq }
  0x35   :  { %187 = vmatprep.mubr.bf16.mxu1 %v841_v0  ;;  %146 = vmatprep.mubr.bf16.mxu0 %v841_v0  ;;  %v687_v1 = vld [vmem:[#allocation5 + $0xc] ss:$16 sps:$4 sm:$0x1f]   ;;  %v689_v2 = vld [vmem:[#allocation5 + $0x4] ss:$16 sps:$4 sm:$0x1f]   ;;  %v76_v8 = vpack.c.bf16 %v885_v5, %v885_v5 }
  0x36   :  { %686 = vset.pattern.permute.xlu0 %v841_v0  ;;  %597 = vmatprep.subr.msk.bf16.mxu1 %vm101_vm0, %v687_v1  ;;  %v691_v3 = vld [vmem:[#allocation5 + $0x8] ss:$16 sps:$4 sm:$0x1f]   ;;  %v692_v4 = vld [vmem:[#allocation5] ss:$16 sps:$4 sm:$0x1f]  }
  0x37   :  { %595 = vmatprep.subr.msk.bf16.mxu0 %vm101_vm0, %v689_v2  ;;  %v109_v6 = vsel %vm101_vm0, %v691_v3, 0  ;;  %v103_v7 = vsel %vm101_vm0, %v692_v4, 0  ;;  %v693_v9 = vld [vmem:[#allocation7 + $0x78] sm:$0xff]   ;;  %v695_v11 = vld [vmem:[#allocation7 + $0x70] sm:$0xff]   ;;  %v697_v14 = vld [vmem:[#allocation7 + $0x68] sm:$0xff]   ;;  %v197_v42 = vand.u32 127, %v196_v41 }
  0x38   :  { %v694_v10 = vld [vmem:[#allocation7 + $0x38] sm:$0xff]   ;;  %170 = vmatpush1.bf16.msra.mxu1 %v109_v6  ;;  %129 = vmatpush1.bf16.msra.mxu0 %v103_v7  ;;  %v696_v12 = vld [vmem:[#allocation7 + $0x30] sm:$0xff]   ;;  %v699_v16 = vld [vmem:[#allocation7 + $0x28] sm:$0xff]   ;;  %s842_s15 = smov [#allocation10]  }
  0x39   :  { %654 = vmatprep.subr.bf16.mxu1 %v693_v9  ;;  %v698_v13 = vld [vmem:[#allocation8 + $0x78] sm:$0xff]   ;;  %v702_v17 = vld [vmem:[#allocation8 + $0x70] sm:$0xff]   ;;  %v701_v18 = vld [vmem:[#allocation7 + $0x60] sm:$0xff]   ;;  %vm199_vm2 = vcmp.eq.s32.totalorder %v197_v42, 0  ;;  %s580_s16 = sshll.u32 %s842_s15, 4  ;;  %s581_s16 = int_to_ptr.vmem [resolvable:$true] %s580_s16 }
  0x3a   :  { %632 = vmatprep.subr.bf16.mxu0 %v698_v13  ;;  %v700_v15 = vld [vmem:[#allocation8 + $0x38] sm:$0xff]   ;;  %v704_v19 = vld [vmem:[#allocation8 + $0x30] sm:$0xff]   ;;  %v703_v20 = vld [vmem:[#allocation7 + $0x20] sm:$0xff]   ;;  %s805_s17 = scalar_lea.vmem %s581_s16, 128  ;;  %p810_p7 = scmp.lt.s32.totalorder %s581_s16, %s581_s16 }
  0x3b   :  { %598 = vmatmul.mubr.msk.bf16.vlgmr.msra.gmra.mxu1 %vm97_vm1, %v76_v8  ;;  %596 = vmatmul.mubr.msk.bf16.vlgmr.msra.gmra.mxu0 %vm97_vm1, %v76_v8  ;;  %v706_v21 = vld [vmem:[#allocation8 + $0x68] sm:$0xff]   ;;  %v705_v22 = vld [vmem:[#allocation7 + $0x58] sm:$0xff]   ;;  %v710_v25 = vld [vmem:[#allocation8 + $0x60] sm:$0xff]   ;;  %p806_p6 = scmp.ne.s32.totalorder %s581_s16, %s805_s17  ;;  %p811_p8 = scmp.lt.s32.totalorder %s805_s17, %s805_s17 }
  0x3c   :  { %655 = vmatpush3.bf16.msra.mxu1 %v694_v10  ;;  %633 = vmatpush3.bf16.msra.mxu0 %v700_v15  ;;  %v708_v23 = vld [vmem:[#allocation8 + $0x28] sm:$0xff]   ;;  %v707_v24 = vld [vmem:[#allocation7 + $0x18] sm:$0xff]   ;;  %v709_v26 = vld [vmem:[#allocation7 + $0x50] sm:$0xff]  }
  0x3d   :  { %656 = vmatprep.subr.bf16.mxu1 %v695_v11  ;;  %634 = vmatprep.subr.bf16.mxu0 %v702_v17  ;;  %v711_v27 = vld [vmem:[#allocation7 + $0x10] sm:$0xff]   ;;  %v712_v28 = vld [vmem:[#allocation8 + $0x20] sm:$0xff]   ;;  %v713_v29 = vld [vmem:[#allocation7 + $0x48] sm:$0xff]   ;;  %p812_p9 = por %p811_p8, %p810_p7 }
  0x3e   :  { %v714_v30 = vld [vmem:[#allocation8 + $0x58] sm:$0xff]   ;;  %v715_v31 = vld [vmem:[#allocation7 + $0x8] sm:$0xff]   ;;  %v717_v33 = vld [vmem:[#allocation7 + $0x40] sm:$0xff]  }
  0x3f   :  { %v716_v32 = vld [vmem:[#allocation8 + $0x18] sm:$0xff]   ;;  %v718_v34 = vld [vmem:[#allocation8 + $0x50] sm:$0xff]   ;;  %v719_v35 = vld [vmem:[#allocation7] sm:$0xff]   ;;  %p813_p10 = pnand %p812_p9, %p806_p6 }
  0x40   :  { %657 = vmatpush3.bf16.msra.mxu1 %v696_v12  ;;  %635 = vmatpush3.bf16.msra.mxu0 %v704_v19  ;;  %v720_v36 = vld [vmem:[#allocation8 + $0x10] sm:$0xff]   ;;  %v721_v37 = vld [vmem:[#allocation8 + $0x48] sm:$0xff]   ;;  %v723_v39 = vld [vmem:[#allocation8 + $0x40] sm:$0xff]  }
  0x41   :  { %658 = vmatprep.subr.bf16.mxu1 %v697_v14  ;;  %636 = vmatprep.subr.bf16.mxu0 %v706_v21  ;;  %v722_v38 = vld [vmem:[#allocation8 + $0x8] sm:$0xff]   ;;  %v724_v40 = vld [vmem:[#allocation8] sm:$0xff]  }
  0x44   :  { %659 = vmatpush3.bf16.msra.mxu1 %v699_v16  ;;  %637 = vmatpush3.bf16.msra.mxu0 %v708_v23 }
  0x45   :  { %660 = vmatprep.subr.bf16.mxu1 %v701_v18  ;;  %638 = vmatprep.subr.bf16.mxu0 %v710_v25 }
  0x48   :  { %661 = vmatpush3.bf16.msra.mxu1 %v703_v20  ;;  %639 = vmatpush3.bf16.msra.mxu0 %v712_v28 }
  0x49   :  { %662 = vmatprep.subr.bf16.mxu1 %v705_v22  ;;  %640 = vmatprep.subr.bf16.mxu0 %v714_v30 }
  0x4c   :  { %663 = vmatpush3.bf16.msra.mxu1 %v707_v24  ;;  %641 = vmatpush3.bf16.msra.mxu0 %v716_v32 }
  0x4d   :  { %664 = vmatprep.subr.bf16.mxu1 %v709_v26  ;;  %642 = vmatprep.subr.bf16.mxu0 %v718_v34 }
  0x50   :  { %665 = vmatpush3.bf16.msra.mxu1 %v711_v27  ;;  %643 = vmatpush3.bf16.msra.mxu0 %v720_v36 }
  0x51   :  { %666 = vmatprep.subr.bf16.mxu1 %v713_v29  ;;  %644 = vmatprep.subr.bf16.mxu0 %v721_v37 }
  0x54   :  { %667 = vmatpush3.bf16.msra.mxu1 %v715_v31  ;;  %645 = vmatpush3.bf16.msra.mxu0 %v722_v38 }
  0x55   :  { %668 = vmatprep.subr.bf16.mxu1 %v717_v33  ;;  %646 = vmatprep.subr.bf16.mxu0 %v723_v39 }
  0x58   :  { %669 = vmatpush3.bf16.msra.mxu1 %v719_v35  ;;  %647 = vmatpush3.bf16.msra.mxu0 %v724_v40 }
  0xfb   :  { %v189_v43 = vpop.f32.mrf.mxu1  ;;  %v148_v44 = vpop.f32.mrf.mxu0 }
  0xfc   :  { %v201_v45 = vsel %vm199_vm2, 0.0, %v189_v43  ;;  %556 = vperm.xlu0 %686, %v189_v43   ;;  %v213_v47 = vpack.c.bf16 %v148_v44, %v148_v44 }
  0xfd   :  { %v203_v46 = vmul.f32 0.15915494, %v201_v45  ;;  %v191_v48 = vpop.f32.mrf.mxu1  ;;  %v150_v49 = vpop.f32.mrf.mxu0 }
  0xfe   :  { %v204_v50 = vmul.f32 0.15915494, %v191_v48  ;;  %v214_v51 = vpack.c.bf16 %v150_v49, %v150_v49 }
  0xff   :  { %v205_v52 = vadd.f32 0.5, %v203_v46  ;;  %v193_v53 = vpop.f32.mrf.mxu1  ;;  %v152_v54 = vpop.f32.mrf.mxu0 }
 0x100   :  { %v206_v55 = vadd.f32 0.5, %v204_v50  ;;  %545 = vmatprep.mubr.bf16.mxu1 %v214_v51  ;;  %569 = vperm.xlu0 %686, %v885_v5   ;;  %v631_v5 = vld [vmem:[%s902_s4] ss:$0 sm:$0xff] }
 0x101   :  { %v207_v56 = vfloor.f32 %v205_v52  ;;  %v194_v57 = vpop.f32.mrf.mxu1  ;;  %546 = vmatmul.mubr.bf16.vlgmr.msra.gmra.mxu1 %v213_v47  ;;  %v153_v58 = vpop.f32.mrf.mxu0 }
 0x102   :  { %v208_v59 = vfloor.f32 %v206_v55 }
 0x103   :  { %v209_v60 = vmul.f32 6.2831855, %v207_v56 }
 0x104   :  { %v210_v61 = vmul.f32 6.2831855, %v208_v59 }
 0x105   :  { %v211_v62 = vsub.f32 %v201_v45, %v209_v60 }
 0x106   :  { %v212_v63 = vsub.f32 %v191_v48, %v210_v61 }
 0x107   :  { %v247_v1 = vpack.c.bf16 %v211_v62, %v211_v62 }
 0x108   :  { %v248_v0 = vpack.c.bf16 %v212_v63, %v212_v63 }
 0x10a   :  { %409 = vmatprep.mubr.bf16.mxu0 %v248_v0 }
 0x10b   :  { %410 = vmatmul.mubr.bf16.vlgmr.msra.gmra.mxu0 %v247_v1 }
 0x177   :  { %v557_v8 = vpop.permute.xlu0 %556 }
 0x178   :  { %v565_v13 = vmul.f32 %v631_v5, %v557_v8 }
 0x17b   :  { %v570_v17 = vpop.permute.xlu0 %569 }
 0x1c1   :  { %v670_v2 = vpop.f32.mrf.mxu1 }
 0x1c3   :  { %v671_v3 = vpop.f32.mrf.mxu1 }
 0x1c4   :  { %v672_v10 = vadd.f32 %v671_v3, %v670_v2 }
 0x1c5   :  { %v673_v4 = vpop.f32.mrf.mxu1 }
 0x1c7   :  { %v674_v6 = vpop.f32.mrf.mxu1 }
 0x1cb   :  { %v648_v7 = vpop.f32.mrf.mxu0 }
 0x1cd   :  { %v649_v9 = vpop.f32.mrf.mxu0 }
 0x1ce   :  { %v650_v11 = vadd.f32 %v649_v9, %v648_v7 }
 0x1cf   :  { %v651_v12 = vpop.f32.mrf.mxu0 }
 0x1d0   :  { %v548_v14 = vadd.f32 %v672_v10, %v650_v11 }
 0x1d1   :  { %v652_v15 = vpop.f32.mrf.mxu0 }
 0x1d2   :  { %v566_v16 = vadd.f32 %v565_v13, %v548_v14 }
 0x1d4   :  { %v572_v18 = vsel %vm199_vm2, %v570_v17, %v566_v16 }
 0x1d5   :  { %573 = vst [vmem:[#allocation10] sm:$0xff] %v572_v18 }
 0x1d6   :  { %816 = shalt.err (!%p813_p10)
}
 0x1d7   :  { %583 = dma.vmem_to_hbm [thread:$0]  %s581_s16, 128, %s903_s5, [#allocation4]  }
 0x1d8   :  { %831 = dma.done.wait [#allocation4], 128  }
 0x1d9   :  { %832 = vsyncadd [#allocation4], 4294967168 }
 0x1da   :  { %587 = vsyncpa [#allocation3], 1 }
 0x1db   :  { %588 = vsyncpa [#allocation6], 1 }
 0x1dc   :  { %589 = vsyncpa [#allocation9], 1 }
 0x1dd   :  { %590 = vsyncpa [#allocation4], 1 }

</bundles_post_ra>
